<compile_context>
chip_gen: v5e
topology: v5e:2x2
jax: 0.10.0
libtpu: 0.0.40
codegen_flags: <defaults>
</compile_context>

<pallas_src>
import functools
import math

import jax
import jax.numpy as jnp
from jax.experimental import pallas as pl
from jax.experimental.pallas import tpu as pltpu


def _round_up(x, m):
    return ((x + m - 1) // m) * m


def _cdiv(a, b):
    return (a + b - 1) // b


def _lora_kernel(alpha_ref, x_ref, a_ref, b_ref, o_ref, xa_ref, *, compute_dtype):
    # xa = alpha * (x @ A) is tiny (TM, rank): compute it once per row tile
    # (first out_dim tile) and keep it in VMEM scratch for the remaining j's.
    @pl.when(pl.program_id(1) == 0)
    def _():
        x = x_ref[...].astype(compute_dtype)
        xa = jnp.dot(x, a_ref[...], preferred_element_type=jnp.float32)
        xa_ref[...] = alpha_ref[0] * xa        # fold alpha into the (TM, rank) tile

    xa = xa_ref[...].astype(compute_dtype)
    xab = jnp.dot(xa, b_ref[...], preferred_element_type=jnp.float32)
    o_ref[...] = xab.astype(o_ref.dtype)


def _vmem_budget_and_limit():
    # Generation-aware: scoped limit ~65% of physical VMEM (v7x: ~41 MiB of
    # 64 MiB; v5e/v6e: ~83 MiB of 128 MiB), tiles sized to ~85% of the limit.
    # Falls back to the smallest (v7x) capacity if the device can't be queried.
    try:
        cap = int(pltpu.get_tpu_info().vmem_capacity_bytes)
    except Exception:
        cap = 64 * 1024 * 1024
    limit = min(int(cap * 0.65), 100 * 1024 * 1024)
    budget = int(limit * 0.85)
    return budget, limit


def _choose_block_m(M, in_dim, tn, rank, x_itemsize, out_itemsize, c_itemsize,
                    block_m_cap, vmem_budget):
    # Double-buffered A (grid-invariant) and B (streamed along j), compute dtype.
    fixed = 2 * (in_dim * rank + rank * tn) * c_itemsize
    # Per-row bytes: double-buffered x / out blocks, the f32 (TM, TN) MXU
    # result (4 B/elem regardless of I/O dtype), the compute-dtype copy of x
    # (only at j == 0), and the (TM, rank) xa scratch (+ cast copy).
    per_row = (2 * in_dim * x_itemsize
               + 2 * tn * out_itemsize
               + 4 * tn
               + in_dim * c_itemsize
               + rank * (4 + c_itemsize))
    tm = (vmem_budget - fixed) // per_row
    tm = int(max(8, min(tm, block_m_cap, _round_up(M, 8))))
    return max(8, (tm // 8) * 8)


def lora_forward(x, A, B, alpha, *, block_m=512, block_n=2048, compute_dtype=None):
    """alpha * (x @ A @ B) with x of shape [..., in_dim]."""
    in_dim, rank = A.shape
    rank_b, out_dim = B.shape
    assert rank_b == rank
    assert x.shape[-1] == in_dim

    if compute_dtype is None:
        # HBM-bound kernel (arithmetic intensity ~ rank FLOP/byte), so the MXU
        # has idle throughput: keep the input precision by default; bf16 is
        # opt-in for callers who want the smaller VMEM footprint.
        compute_dtype = x.dtype
    compute_dtype = jnp.dtype(compute_dtype)

    lead = x.shape[:-1]
    M = math.prod(lead) if lead else 1
    x2d = x.reshape(M, in_dim)

    # A / B are tiny and grid-invariant along i: cast once in the wrapper
    # instead of re-casting every grid step inside the kernel.
    A = A.astype(compute_dtype)
    B = B.astype(compute_dtype)

    # Lane-dense output tiles: pad only B (tiny) so the output columns are a
    # multiple of 128, and tile out_dim so TM stays large for wide outputs.
    out_pad = _round_up(out_dim, 128)
    grid_n = _cdiv(out_pad, max(128, block_n))
    tn = _round_up(_cdiv(out_pad, grid_n), 128)
    out_cols = grid_n * tn
    if out_cols != out_dim:
        B = jnp.pad(B, ((0, 0), (0, out_cols - out_dim)))

    vmem_budget, vmem_limit = _vmem_budget_and_limit()
    tm = _choose_block_m(M, in_dim, tn, rank,
                         x2d.dtype.itemsize, x2d.dtype.itemsize,
                         compute_dtype.itemsize, block_m, vmem_budget)

    # No padding of x / no row slice of out: cdiv grid with a partial last
    # row block (OOB rows are masked by the pipeline).
    grid_m = _cdiv(M, tm)
    # Keep >= 2 row blocks whenever possible so both v7x TensorCores engage.
    while grid_m < 2 and tm > 8:
        tm = max(8, _round_up(tm // 2, 8))
        grid_m = _cdiv(M, tm)

    alpha_arr = jnp.asarray([alpha], dtype=jnp.float32)

    cost = pl.CostEstimate(
        flops=2 * M * rank * (in_dim + out_dim),
        transcendentals=0,
        bytes_accessed=(
            x2d.size * x2d.dtype.itemsize
            + A.size * A.dtype.itemsize
            + B.size * B.dtype.itemsize
            + M * out_cols * x2d.dtype.itemsize
        ),
    )

    out = pl.pallas_call(
        functools.partial(_lora_kernel, compute_dtype=compute_dtype),
        out_shape=jax.ShapeDtypeStruct((M, out_cols), x2d.dtype),
        grid_spec=pltpu.PrefetchScalarGridSpec(
            num_scalar_prefetch=1,          # alpha -> SMEM; no recompile per value
            grid=(grid_m, grid_n),
            in_specs=[
                pl.BlockSpec((tm, in_dim), lambda i, j, alpha_ref: (i, 0)),
                pl.BlockSpec((in_dim, rank), lambda i, j, alpha_ref: (0, 0)),
                pl.BlockSpec((rank, tn), lambda i, j, alpha_ref: (0, j)),
            ],
            out_specs=pl.BlockSpec((tm, tn), lambda i, j, alpha_ref: (i, j)),
            scratch_shapes=[pltpu.VMEM((tm, rank), jnp.float32)],
        ),
        compiler_params=pltpu.CompilerParams(
            # Row blocks independent -> "parallel" (megacore); out_dim axis is
            # sequential so the xa scratch written at j == 0 can be reused.
            dimension_semantics=("parallel", "arbitrary"),
            vmem_limit_bytes=vmem_limit,
        ),
        cost_estimate=cost,
    )(alpha_arr, x2d, A, B)

    if out_cols != out_dim:
        out = out[:, :out_dim]      # only when out_dim is not a multiple of 128
    return out.reshape(*lead, out_dim)


def init_lora_params(key, in_dim, rank, out_dim, dtype=jnp.float32):
    # Matches torch.nn.init.kaiming_uniform_(A, a=sqrt(5)) on THIS module's
    # (in_dim, rank) parameter: torch's fan_in = tensor.size(1) = rank, so
    # bound = 1/sqrt(rank).  B starts at zero, faithful to the module.
    fan_in = rank
    gain = math.sqrt(2.0 / (1.0 + 5.0))
    bound = math.sqrt(3.0) * gain / math.sqrt(fan_in)
    A = jax.random.uniform(key, (in_dim, rank), dtype, minval=-bound, maxval=bound)
    B = jnp.zeros((rank, out_dim), dtype)
    return A, B


if __name__ == "__main__":
    key = jax.random.PRNGKey(0)
    k_a, k_x1, k_x2, k_A2, k_B2, k_x3, k_A3, k_B3 = jax.random.split(key, 8)

    batch, seq, in_dim, rank, out_dim = 2, 8, 32, 4, 32
    alpha = 16.0

    # 1) Module-faithful init (B = 0): output must be exactly zero.
    x = jax.random.normal(k_x1, (batch, seq, in_dim), jnp.float32)
    A0, B0 = init_lora_params(k_a, in_dim, rank, out_dim)
    out0 = lora_forward(x, A0, B0, alpha)
    jax.block_until_ready(out0)
    assert out0.shape == (batch, seq, out_dim)
    assert jnp.allclose(out0, 0.0)

    # 2) Non-trivial B.  Operands in {-1, 0, 1} with alpha a power of two keep
    #    every intermediate exactly representable, so the comparison is exact
    #    for any MXU precision mode and in interpret mode alike.
    def randi(k, shape):
        return jax.random.randint(k, shape, -1, 2).astype(jnp.float32)

    x2 = randi(k_x2, (batch, seq, in_dim))
    A2 = randi(k_A2, (in_dim, rank))
    B2 = randi(k_B2, (rank, out_dim))
    out2 = lora_forward(x2, A2, B2, alpha)
    jax.block_until_ready(out2)
    ref2 = alpha * (x2 @ A2 @ B2)
    assert out2.shape == (batch, seq, out_dim)
    assert jnp.allclose(out2, ref2, atol=1e-5, rtol=1e-5)

    # 3) Wider out_dim with small block_m/block_n to exercise the full 2-D
    #    grid (multiple row tiles, multiple out_dim tiles reusing the xa scratch).
    out_dim3 = 256
    x3 = randi(k_x3, (batch, seq, in_dim))
    A3 = randi(k_A3, (in_dim, rank))
    B3 = randi(k_B3, (rank, out_dim3))
    out3 = lora_forward(x3, A3, B3, alpha, block_m=8, block_n=128)
    jax.block_until_ready(out3)
    ref3 = alpha * (x3 @ A3 @ B3)
    assert out3.shape == (batch, seq, out_dim3)
    assert jnp.allclose(out3, ref3, atol=1e-5, rtol=1e-5)

    print("KERNEL_OK")
</pallas_src>

<mosaic_0001>
module attributes {stable_mosaic.version = 11 : i64} {
  func.func @_lora_kernel(%arg0: i32, %arg1: i32, %arg2: memref<1xf32, #tpu.memory_space<smem>>, %arg3: memref<8x32xf32, #tpu.memory_space<vmem>>, %arg4: memref<32x4xf32, #tpu.memory_space<vmem>>, %arg5: memref<4x128xf32, #tpu.memory_space<vmem>>, %arg6: memref<8x128xf32, #tpu.memory_space<vmem>>, %arg7: memref<8x4xf32, #tpu.memory_space<vmem>>) attributes {dimension_semantics = [#tpu.dimension_semantics<parallel>, #tpu.dimension_semantics<arbitrary>], iteration_bounds = array<i64: 2, 1>, scalar_prefetch = 1 : i64, scratch_operands = 1 : i64, tpu.core_type = #tpu.core_type<tc>, window_params = [{transform_indices = @transform_0, window_bounds = array<i64: 8, 32>}, {pipeline_mode = #tpu.pipeline_mode<synchronous>, transform_indices = @transform_1, window_bounds = array<i64: 32, 4>}, {transform_indices = @transform_2, window_bounds = array<i64: 4, 128>}, {transform_indices = @transform_3, window_bounds = array<i64: 8, 128>}]} {
    %c0_i32 = arith.constant 0 : i32
    %0 = arith.cmpi eq, %arg1, %c0_i32 : i32
    %1 = arith.extui %0 : i1 to i32
    %c0_i32_0 = arith.constant 0 : i32
    %2 = arith.cmpi ne, %1, %c0_i32_0 : i32
    scf.if %2 {
      %c0_6 = arith.constant 0 : index
      %c0_7 = arith.constant 0 : index
      %7 = vector.load %arg3[%c0_6, %c0_7] : memref<8x32xf32, #tpu.memory_space<vmem>>, vector<8x32xf32>
      %c0_8 = arith.constant 0 : index
      %c0_9 = arith.constant 0 : index
      %8 = vector.load %arg4[%c0_8, %c0_9] : memref<32x4xf32, #tpu.memory_space<vmem>>, vector<32x4xf32>
      %cst_10 = arith.constant dense<0.000000e+00> : vector<8x4xf32>
      %9 = tpu.matmul %7, %8, %cst_10 {dimension_numbers = #tpu.dot_dimension_numbers<[1], [0], [0], [1], [0, 0, 1, 1], [], []>} : vector<8x32xf32>, vector<32x4xf32>, vector<8x4xf32> -> vector<8x4xf32>
      %c0_11 = arith.constant 0 : index
      %10 = memref.load %arg2[%c0_11] : memref<1xf32, #tpu.memory_space<smem>>
      %11 = vector.broadcast %10 : f32 to vector<8x4xf32>
      %12 = arith.mulf %11, %9 : vector<8x4xf32>
      %c0_12 = arith.constant 0 : index
      %c0_13 = arith.constant 0 : index
      %13 = vector.load %arg7[%c0_12, %c0_13] : memref<8x4xf32, #tpu.memory_space<vmem>>, vector<8x4xf32>
      tpu.vector_store %arg7[%c0_12, %c0_13], %12 {strides = array<i32>} : memref<8x4xf32, #tpu.memory_space<vmem>>, vector<8x4xf32>,
    } else {
    }
    %c0 = arith.constant 0 : index
    %c0_1 = arith.constant 0 : index
    %3 = vector.load %arg7[%c0, %c0_1] : memref<8x4xf32, #tpu.memory_space<vmem>>, vector<8x4xf32>
    %c0_2 = arith.constant 0 : index
    %c0_3 = arith.constant 0 : index
    %4 = vector.load %arg5[%c0_2, %c0_3] : memref<4x128xf32, #tpu.memory_space<vmem>>, vector<4x128xf32>
    %cst = arith.constant dense<0.000000e+00> : vector<8x128xf32>
    %5 = tpu.matmul %3, %4, %cst {dimension_numbers = #tpu.dot_dimension_numbers<[1], [0], [0], [1], [0, 0, 1, 1], [], []>} : vector<8x4xf32>, vector<4x128xf32>, vector<8x128xf32> -> vector<8x128xf32>
    %c0_4 = arith.constant 0 : index
    %c0_5 = arith.constant 0 : index
    %6 = vector.load %arg6[%c0_4, %c0_5] : memref<8x128xf32, #tpu.memory_space<vmem>>, vector<8x128xf32>
    tpu.vector_store %arg6[%c0_4, %c0_5], %5 {strides = array<i32>} : memref<8x128xf32, #tpu.memory_space<vmem>>, vector<8x128xf32>,
    return
  }
  func.func @transform_0(%arg0: i32, %arg1: i32, %arg2: memref<1xf32, #tpu.memory_space<smem>>) -> (i32, i32) {
    %c0_i32 = arith.constant 0 : i32
    %c0_i32_0 = arith.constant 0 : i32
    return %arg0, %c0_i32 : i32, i32
  }
  func.func @transform_1(%arg0: i32, %arg1: i32, %arg2: memref<1xf32, #tpu.memory_space<smem>>) -> (i32, i32) {
    %c0_i32 = arith.constant 0 : i32
    %c0_i32_0 = arith.constant 0 : i32
    %c0_i32_1 = arith.constant 0 : i32
    return %c0_i32, %c0_i32_0 : i32, i32
  }
  func.func @transform_2(%arg0: i32, %arg1: i32, %arg2: memref<1xf32, #tpu.memory_space<smem>>) -> (i32, i32) {
    %c0_i32 = arith.constant 0 : i32
    %c0_i32_0 = arith.constant 0 : i32
    return %c0_i32, %arg1 : i32, i32
  }
  func.func @transform_3(%arg0: i32, %arg1: i32, %arg2: memref<1xf32, #tpu.memory_space<smem>>) -> (i32, i32) {
    %c0_i32 = arith.constant 0 : i32
    return %arg0, %arg1 : i32, i32
  }
}

</mosaic_0001>

<bundles_post_ra>
// kernel: tpu_custom_call.1
= control target key start
LH: loop header
LB: loop body
LE: loop exit
PB: predicated region body
PF: predicated region fallthrough
CT: control target
= control target key end

     0   :  { %s658_s0 = inlined_call_operand.<no memory space> [shape: f32[1], index: 0, kind: input, shape index: {}]   ;;  %s659_s1 = inlined_call_operand.vmem [shape: f32[16,32], index: 1, kind: input, shape index: {}]   ;;  %s660_s2 = inlined_call_operand.vmem [shape: f32[32,4], index: 2, kind: input, shape index: {}]   ;;  %s661_s3 = inlined_call_operand.vmem [shape: f32[4,128], index: 3, kind: input, shape index: {}]   ;;  %s662_s4 = inlined_call_operand.hbm [shape: f32[16,128], index: 4, kind: output, shape index: {}]  }
   0x1   :  { %9 = sst [smem:[#allocation4]] %s658_s0 }
   0x2   :  { %10 = vsyncpa [#allocation6], 0 }
   0x3   :  { %12 = vsyncpa [#allocation6 + $0x1], 0  ;;  %s546_s17 = smov 0   ;;  %s548_s18 = smov 0  }
   0x4   :  { %s550_s19 = smov 0   ;;  %s552_s20 = smov 0  }
   0x5   :  { %s554_s21 = smov 0   ;;  %s556_s22 = smov 0  }
   0x6 LB: > { %s368_s0 = sadd.s32 4294967295, %s516_s22   ;;  %s369_s23 = sadd.s32 4294967294, %s516_s22   ;;  %s516_s22 = sphi %s556_s22, %s18_s22   ;;  %s512_s21 = sphi %s554_s21, %s669_s21   ;;  %s508_s20 = sphi %s552_s20, %s668_s20   ;;  %s504_s19 = sphi %s550_s19, %s667_s19   ;;  %s500_s18 = sphi %s548_s18, %s666_s18   ;;  %s496_s17 = sphi %s546_s17, %s665_s17  }
   0x7   : > { %s30_s24 = sadd.s32 1, %s512_s21  ;;  %s112_s25 = sadd.s32 1, %s504_s19 }
   0x8   : > { %p32_p0 = scmp.ge.s32.totalorder %s30_s24, 2  ;;  %p122_p1 = scmp.ne.s32.totalorder %s504_s19, %s500_s18 }
   0x9   : > { %p123_p2 = scmp.eq.s32.totalorder %s368_s0, 1  ;;  %p128_p3 = scmp.ne.s32.totalorder %s500_s18, %s496_s17 }
   0xa   : > { %s671_s24 = smov (%p32_p0, %s30_s24), 0  ;;  %p129_p5 = scmp.eq.s32.totalorder %s369_s23, 1 }
   0xb   : > { %p586_p4 = por %p123_p2, %p122_p1  ;;  %s107_s27 = ssub.s32 %s512_s21, %s671_s24 }
   0xc   : > { %p373_p6 = scmp.ge.s32.totalorder %s516_s22, 1  ;;  %p110_p7 = scmp.eq.s32.totalorder %s107_s27, 0 }
   0xd   : > { %p593_p8 = por %p129_p5, %p128_p3  ;;  %p164_p9 = scmp.lt.s32.totalorder %s516_s22, 3 }
   0xe   : > { %s599_s29 = scalar_select %p110_p7, %s504_s19, %s112_s25  }
   0xf   : > { %p165_p10 = pnand %p373_p6, %p164_p9 }
  0x10   : > { %p191_p11 = scmp.lt.s32.totalorder (!%p165_p10), %s508_s20, 1  ;;  %s232_s25 = sld [smem:[#allocation4]] (!%p165_p10) }
  0x11   : > { %168 = sbr.rel (%p165_p10) target bundleno = 295 (0x127), region = 32  ;;  %s188_s27 = sand.u32 (!%p165_p10), 1, %s500_s18  }
  0x12   : > { %s374_s30 = sshll.u32 (!%p165_p10), %s188_s27, 3  ;;  %s380_s5 = sshll.u32 (!%p165_p10), %s508_s20, 3 }
  0x13   : > { %s280_s8 = scalar_lea.hbm (!%p165_p10), %s662_s4, %s380_s5  ;;  %s190_s9 = scalar_lea.vmem (!%p165_p10), [#allocation5], %s374_s30 }
  0x14   : > { %s284_s11 = sshll.u32 (!%p165_p10), %s280_s8, 4  ;;  %s269_s12 = scalar_lea.sflag (!%p165_p10), [#allocation6], %s188_s27  ;;  %s285_s11 = int_to_ptr.hbm [resolvable:$true] %s284_s11 }
  0x16   : > { %v207_v0 = vld [vmem:[%s660_s2 + $0x18] sm:$0xff]  ;;  %v206_v1 = vld [vmem:[%s660_s2 + $0x10] sm:$0xff]  ;;  %v205_v2 = vld [vmem:[%s660_s2 + $0x8] sm:$0xff]  ;;  %s192_s10 = scalar_select %p191_p11, %s508_s20, 1  ;;  %vm208_vm0 = vcmask 261120   ;;  %vm243_vm1 = vcmask 1043456   ;;  %v233_v6 = vstv %s232_s25 }
  0x17   : > { %224 = vmatpush.msra.mxu0 %v207_v0  ;;  %v204_v3 = vld [vmem:[%s660_s2] sm:$0xff]  ;;  %vm235_vm2 = vcmask 31744  }
  0x18   : > { %s375_s13 = sshll.u32 %s192_s10, 3  ;;  %v238_v5 = vld [vmem:[%s661_s3] sm:$0xf]  ;;  %s282_s10 = sshll.u32 %s190_s9, 4  ;;  %s283_s10 = int_to_ptr.vmem [resolvable:$true] %s282_s10 }
  0x19   : > { %225 = vmatpush.msra.mxu0 %v206_v1  ;;  %s194_s16 = scalar_lea.vmem %s659_s1, %s375_s13  ;;  %377 = vmatpush.msk.msra.mxu1 %vm243_vm1, %v238_v5  ;;  %s452_s13 = sshra.s32 %s285_s11, 4  ;;  %s453_s13 = int_to_ptr.hbm [resolvable:$true] %s452_s13 }
  0x1a   : > { %v203_v4 = vld [vmem:[%s194_s16] sm:$0xff]  ;;  %s454_s14 = scalar_lea.hbm %s453_s13, 8  ;;  %s458_s16 = scalar_lea.hbm %s662_s4, 16 }
  0x1b   : > { %226 = vmatpush.msra.mxu0 %v205_v2  ;;  %p455_p12 = scmp.ne.s32.totalorder %s453_s13, %s454_s14  ;;  %p459_p1 = scmp.lt.s32.totalorder %s453_s13, %s662_s4 }
  0x1c   : > { %p460_p2 = scmp.lt.s32.totalorder %s458_s16, %s454_s14 }
  0x1d   : > { %227 = vmatpush.msra.mxu0 %v204_v3  ;;  %p456_p13 = pnand %p455_p12, %p586_p4 }
  0x1e   : > { %376 = vmatmul.msk.f32.vlgmr.msra.gmra.mxu0 %vm208_vm0, %v203_v4  ;;  %p461_p3 = por %p460_p2, %p459_p1 }
  0x1f   : > { %p457_p0 = pneg %p456_p13 }
  0x21   : > { %p462_p5 = pnand %p461_p3, %p457_p0 }
  0x9b   : > { %v229_v7 = vpop.f32.mrf.mxu0 }
  0x9c   : > { %v234_v8 = vmul.f32 %v233_v6, %v229_v7 }
  0x9e   : > { %236 = vst.msk [vmem:[#allocation2] sm:$0xff] %vm235_vm2, %v234_v8 }
  0xa5   : > { %v237_v9 = vld [vmem:[#allocation2] sm:$0xff] }
  0xa6   : > { %378 = vmatmul.msk.f32.vlgmr.msra.gmra.mxu1 %vm235_vm2, %v237_v9 }
 0x123   : > { %v264_v10 = vpop.f32.mrf.mxu1 }
 0x124   : > { %267 = vst [vmem:[%s190_s9] sm:$0xff] %v264_v10 }
 0x125   : > { %465 = shalt.err (!%p462_p5)
}
 0x126   : > { %383 = dma.vmem_to_hbm [thread:$0]  (%p586_p4), %s283_s10, 128, %s285_s11, %s269_s12  }
 0x127 PF: > { %p389_p6 = scmp.ge.s32.totalorder %s516_s22, 2  ;;  %s296_s25 = sand.u32 1, %s496_s17  }
 0x128   : > { %s297_s27 = scalar_lea.sflag [#allocation6], %s296_s25 }
 0x129   : > { %p386_p7 = pnand %p389_p6, %p593_p8 }
 0x12b   : > { %p387_p9 = pneg %p386_p7 }
 0x12d   : > { %491 = dma.done.wait (%p387_p9), %s297_s27, 128  }
 0x12e   : > { %493 = vsyncadd (%p387_p9), %s297_s27, 4294967168  ;;  %s18_s22 = sadd.s32 1, %s516_s22   ;;  %s665_s17 = smov %s500_s18 }
 0x12f   : > { %p15_p10 = scmp.ge.s32.totalorder %s18_s22, 4   ;;  %s666_s18 = smov %s504_s19 }
 0x130   : > { %s667_s19 = smov %s599_s29  ;;  %s668_s20 = smov %s512_s21 }
 0x131   : > { %s669_s21 = smov %s671_s24  ;;  %17 = sbr.rel (!%p15_p10) target bundleno = 6 (0x6), region = 74 }
 0x136   :  { %303 = vsyncpa [#allocation6], 1 }
 0x137   :  { %305 = vsyncpa [#allocation6 + $0x1], 1 }

</bundles_post_ra>
